<compile_context>
chip_gen: v6e
topology: v6e:2x2x1
jax: 0.10.0
libtpu: 0.0.40
codegen_flags: <defaults>
</compile_context>

<pallas_src>
import math

import jax
import jax.numpy as jnp
from jax.experimental import pallas as pl
from jax.experimental.pallas import tpu as pltpu

_EPS = 1e-8


def _round_up(x, m):
    return ((x + m - 1) // m) * m


def _make_jsd_kernel(batch, tb, eps):
    log_eps = float(math.log(eps))

    def kernel(lp_ref, lq_ref, out_ref):
        i = pl.program_id(0)

        lp = lp_ref[...].astype(jnp.float32)
        lq = lq_ref[...].astype(jnp.float32)

        # Numerically-stable softmax over the class (lane) axis.
        # Per element: 1 exp + 1 log (for log_m); per ROW: 1 log + 1 reciprocal.
        lp_s = lp - jnp.max(lp, axis=-1, keepdims=True)
        ep = jnp.exp(lp_s)
        sp = jnp.sum(ep, axis=-1, keepdims=True)
        p = jnp.maximum(ep * pl.reciprocal(sp, approx=False), eps)   # clamp(min=eps)
        log_p = jnp.maximum(lp_s - jnp.log(sp), log_eps)             # log of clamped p

        lq_s = lq - jnp.max(lq, axis=-1, keepdims=True)
        eq = jnp.exp(lq_s)
        sq = jnp.sum(eq, axis=-1, keepdims=True)
        q = jnp.maximum(eq * pl.reciprocal(sq, approx=False), eps)
        log_q = jnp.maximum(lq_s - jnp.log(sq), log_eps)

        s = p + q                      # 2*m
        log_m = jnp.log(0.5 * s)       # the only remaining per-element log
        # p*(log_p - log_m) + q*(log_q - log_m) == p*log_p + q*log_q - s*log_m
        term = p * log_p + q * log_q - s * log_m

        # Per-row lane reduction first, then mask the ragged last block's
        # undefined rows with a SELECT (all reductions above are per-row, so
        # garbage in those rows cannot contaminate valid rows).
        row_sum = jnp.sum(term, axis=-1, keepdims=True)              # (tb, 1)
        row_ids = i * tb + jax.lax.broadcasted_iota(jnp.int32, (tb, 1), 0)
        row_sum = jnp.where(row_ids < batch, row_sum, 0.0)

        # Per-block partial sum; the cross-block sum, /B and *0.5 happen in the
        # wrapper, so the grid axis stays "parallel" (v7x 2-TC sharding).
        out_ref[0, 0] = jnp.sum(row_sum)

    return kernel


def jsd(logits_p, logits_q, eps=_EPS):
    """Jensen-Shannon divergence between softmax(logits_p) and softmax(logits_q).

    logits_*: (B, C) float arrays, softmax over C (== PyTorch dim=1).
    Returns a scalar float32.
    """
    assert logits_p.shape == logits_q.shape and logits_p.ndim == 2
    assert logits_p.dtype == logits_q.dtype
    B, C = logits_p.shape
    itemsize = jnp.dtype(logits_p.dtype).itemsize

    # Generation-aware block / VMEM budgets.
    try:
        vmem_cap = int(pltpu.get_tpu_info().vmem_capacity_bytes)
    except Exception:  # be conservative if the query is unavailable
        vmem_cap = 64 << 20
    if vmem_cap <= (64 << 20):          # v7x: 64 MiB VMEM per TensorCore
        target_block_bytes = 3 << 20
        vmem_ceiling = 48 << 20
    else:                               # v5e / v6e: 128 MiB VMEM
        target_block_bytes = 6 << 20
        vmem_ceiling = 100 << 20

    # Row tile: multiple of the sublane pack (16 for 2-byte dtypes), sized to
    # ~target_block_bytes per input block, capped so nb >= 2 when B allows it
    # (keeps both v7x TensorCores busy on the "parallel" batch axis).
    sub = 16 if itemsize == 2 else 8
    tb = max(sub, (target_block_bytes // (C * itemsize)) // sub * sub)
    tb = min(tb, max(sub, _round_up(-(-B // 2), sub)))
    if tb >= B:
        tb = B                          # block dim == full array dim is always legal
        nb = 1
    else:
        nb = pl.cdiv(B, tb)

    # VMEM budget: 2 inputs x 2 pipeline buffers (input dtype) + ~8 live f32
    # elementwise temporaries of one compute block + slack, clamped per-gen.
    io_bytes = tb * C * itemsize
    f32_bytes = tb * C * 4
    vmem_limit = int(min(max(4 * io_bytes + 8 * f32_bytes + (2 << 20), 16 << 20),
                         vmem_ceiling))

    partials = pl.pallas_call(
        _make_jsd_kernel(B, tb, eps),
        out_shape=jax.ShapeDtypeStruct((nb, 1), jnp.float32),
        grid_spec=pltpu.PrefetchScalarGridSpec(
            num_scalar_prefetch=0,
            grid=(nb,),
            in_specs=[
                pl.BlockSpec((tb, C), lambda i: (i, 0)),
                pl.BlockSpec((tb, C), lambda i: (i, 0)),
            ],
            out_specs=pl.BlockSpec((1, 1), lambda i: (i, 0),
                                   memory_space=pltpu.MemorySpace.SMEM),
        ),
        compiler_params=pltpu.CompilerParams(
            dimension_semantics=("parallel",),
            vmem_limit_bytes=vmem_limit,
        ),
    )(logits_p, logits_q)

    return 0.5 * jnp.sum(partials) / B


def _jsd_ref(logits_p, logits_q, eps=_EPS):
    # pure-JAX reference mirroring the PyTorch module (f32 math)
    logits_p = logits_p.astype(jnp.float32)
    logits_q = logits_q.astype(jnp.float32)
    p = jnp.maximum(jax.nn.softmax(logits_p, axis=1), eps)
    q = jnp.maximum(jax.nn.softmax(logits_q, axis=1), eps)
    m = 0.5 * (p + q)
    log_m = jnp.log(m)
    b = logits_p.shape[0]
    kl_pm = jnp.sum(p * (jnp.log(p) - log_m)) / b
    kl_qm = jnp.sum(q * (jnp.log(q) - log_m)) / b
    return 0.5 * (kl_pm + kl_qm)


if __name__ == "__main__":
    key = jax.random.PRNGKey(0)
    k1, k2, k3, k4, k5, k6 = jax.random.split(key, 6)

    # (batch, num_classes); softmax over the class axis, as in the module.
    B, C = 8, 32
    logits_p = jax.random.normal(k1, (B, C), dtype=jnp.float32)
    logits_q = jax.random.normal(k2, (B, C), dtype=jnp.float32)
    out = jax.block_until_ready(jsd(logits_p, logits_q))
    ref = jax.block_until_ready(_jsd_ref(logits_p, logits_q))
    assert jnp.allclose(out, ref, rtol=1e-5, atol=1e-6), (out, ref)

    # Ragged path: C not a multiple of 128 AND B not a multiple of the row
    # tile — exercises the unpadded block + in-kernel row mask.
    B2, C2 = 10, 200
    lp2 = jax.random.normal(k3, (B2, C2), dtype=jnp.float32)
    lq2 = jax.random.normal(k4, (B2, C2), dtype=jnp.float32)
    out2 = jax.block_until_ready(jsd(lp2, lq2))
    ref2 = jax.block_until_ready(_jsd_ref(lp2, lq2))
    assert jnp.allclose(out2, ref2, rtol=1e-5, atol=1e-6), (out2, ref2)

    # bf16 logits pass straight through (half the HBM bytes); compute is f32.
    B3, C3 = 12, 160
    lp3 = jax.random.normal(k5, (B3, C3), dtype=jnp.float32).astype(jnp.bfloat16)
    lq3 = jax.random.normal(k6, (B3, C3), dtype=jnp.float32).astype(jnp.bfloat16)
    out3 = jax.block_until_ready(jsd(lp3, lq3))
    ref3 = jax.block_until_ready(_jsd_ref(lp3, lq3))
    assert jnp.allclose(out3, ref3, rtol=1e-4, atol=1e-5), (out3, ref3)

    print("KERNEL_OK")
</pallas_src>

<mosaic_0001>
module attributes {stable_mosaic.version = 11 : i64} {
  func.func @kernel(%arg0: i32, %arg1: memref<8x32xf32, #tpu.memory_space<vmem>>, %arg2: memref<8x32xf32, #tpu.memory_space<vmem>>, %arg3: memref<1x1xf32, #tpu.memory_space<smem>>) attributes {dimension_semantics = [#tpu.dimension_semantics<parallel>], iteration_bounds = array<i64: 1>, scalar_prefetch = 0 : i64, scratch_operands = 0 : i64, tpu.core_type = #tpu.core_type<tc>, window_params = [{transform_indices = @transform_0, window_bounds = array<i64: 8, 32>}, {transform_indices = @transform_1, window_bounds = array<i64: 8, 32>}, {transform_indices = @transform_2, window_bounds = array<i64: 1, 1>}]} {
    %c0 = arith.constant 0 : index
    %c0_0 = arith.constant 0 : index
    %0 = vector.load %arg1[%c0, %c0_0] : memref<8x32xf32, #tpu.memory_space<vmem>>, vector<8x32xf32>
    %c0_1 = arith.constant 0 : index
    %c0_2 = arith.constant 0 : index
    %1 = vector.load %arg2[%c0_1, %c0_2] : memref<8x32xf32, #tpu.memory_space<vmem>>, vector<8x32xf32>
    %cst = arith.constant dense<0xFF800000> : vector<8xf32>
    %2 = vector.multi_reduction <maximumf>, %0, %cst [1] : vector<8x32xf32> to vector<8xf32>
    %3 = vector.shape_cast %2 : vector<8xf32> to vector<8x1xf32>
    %4 = vector.broadcast %3 : vector<8x1xf32> to vector<8x32xf32>
    %5 = arith.subf %0, %4 : vector<8x32xf32>
    %6 = math.exp %5 : vector<8x32xf32>
    %cst_3 = arith.constant dense<0.000000e+00> : vector<8xf32>
    %7 = vector.multi_reduction <add>, %6, %cst_3 [1] : vector<8x32xf32> to vector<8xf32>
    %8 = vector.shape_cast %7 : vector<8xf32> to vector<8x1xf32>
    %9 = tpu.reciprocal %8 : vector<8x1xf32> -> vector<8x1xf32>
    %10 = vector.broadcast %9 : vector<8x1xf32> to vector<8x32xf32>
    %11 = arith.mulf %6, %10 : vector<8x32xf32>
    %cst_4 = arith.constant 9.99999993E-9 : f32
    %12 = vector.broadcast %cst_4 : f32 to vector<8x32xf32>
    %13 = arith.maximumf %11, %12 : vector<8x32xf32>
    %14 = math.log %8 : vector<8x1xf32>
    %15 = vector.broadcast %14 : vector<8x1xf32> to vector<8x32xf32>
    %16 = arith.subf %5, %15 : vector<8x32xf32>
    %cst_5 = arith.constant -18.420681 : f32
    %17 = vector.broadcast %cst_5 : f32 to vector<8x32xf32>
    %18 = arith.maximumf %16, %17 : vector<8x32xf32>
    %cst_6 = arith.constant dense<0xFF800000> : vector<8xf32>
    %19 = vector.multi_reduction <maximumf>, %1, %cst_6 [1] : vector<8x32xf32> to vector<8xf32>
    %20 = vector.shape_cast %19 : vector<8xf32> to vector<8x1xf32>
    %21 = vector.broadcast %20 : vector<8x1xf32> to vector<8x32xf32>
    %22 = arith.subf %1, %21 : vector<8x32xf32>
    %23 = math.exp %22 : vector<8x32xf32>
    %cst_7 = arith.constant dense<0.000000e+00> : vector<8xf32>
    %24 = vector.multi_reduction <add>, %23, %cst_7 [1] : vector<8x32xf32> to vector<8xf32>
    %25 = vector.shape_cast %24 : vector<8xf32> to vector<8x1xf32>
    %26 = tpu.reciprocal %25 : vector<8x1xf32> -> vector<8x1xf32>
    %27 = vector.broadcast %26 : vector<8x1xf32> to vector<8x32xf32>
    %28 = arith.mulf %23, %27 : vector<8x32xf32>
    %cst_8 = arith.constant 9.99999993E-9 : f32
    %29 = vector.broadcast %cst_8 : f32 to vector<8x32xf32>
    %30 = arith.maximumf %28, %29 : vector<8x32xf32>
    %31 = math.log %25 : vector<8x1xf32>
    %32 = vector.broadcast %31 : vector<8x1xf32> to vector<8x32xf32>
    %33 = arith.subf %22, %32 : vector<8x32xf32>
    %cst_9 = arith.constant -18.420681 : f32
    %34 = vector.broadcast %cst_9 : f32 to vector<8x32xf32>
    %35 = arith.maximumf %33, %34 : vector<8x32xf32>
    %36 = arith.addf %13, %30 : vector<8x32xf32>
    %cst_10 = arith.constant 5.000000e-01 : f32
    %37 = vector.broadcast %cst_10 : f32 to vector<8x32xf32>
    %38 = arith.mulf %37, %36 : vector<8x32xf32>
    %39 = math.log %38 : vector<8x32xf32>
    %40 = arith.mulf %13, %18 : vector<8x32xf32>
    %41 = arith.mulf %30, %35 : vector<8x32xf32>
    %42 = arith.addf %40, %41 : vector<8x32xf32>
    %43 = arith.mulf %36, %39 : vector<8x32xf32>
    %44 = arith.subf %42, %43 : vector<8x32xf32>
    %cst_11 = arith.constant dense<0.000000e+00> : vector<8xf32>
    %45 = vector.multi_reduction <add>, %44, %cst_11 [1] : vector<8x32xf32> to vector<8xf32>
    %46 = vector.shape_cast %45 : vector<8xf32> to vector<8x1xf32>
    %c8_i32 = arith.constant 8 : i32
    %47 = arith.muli %arg0, %c8_i32 : i32
    %48 = tpu.iota {dimensions = array<i32: 0>} : vector<8x1xi32>
    %49 = vector.broadcast %47 : i32 to vector<8x1xi32>
    %50 = arith.addi %49, %48 : vector<8x1xi32>
    %c8_i32_12 = arith.constant 8 : i32
    %51 = vector.broadcast %c8_i32_12 : i32 to vector<8x1xi32>
    %52 = arith.cmpi slt, %50, %51 : vector<8x1xi32>
    %cst_13 = arith.constant 0.000000e+00 : f32
    %53 = vector.broadcast %cst_13 : f32 to vector<8x1xf32>
    %54 = arith.select %52, %46, %53 : vector<8x1xi1>, vector<8x1xf32>
    %55 = vector.shape_cast %54 : vector<8x1xf32> to vector<1x8x1xf32>
    %cst_14 = arith.constant dense<0.000000e+00> : vector<1xf32>
    %56 = vector.multi_reduction <add>, %55, %cst_14 [1, 2] : vector<1x8x1xf32> to vector<1xf32>
    %57 = vector.shape_cast %56 : vector<1xf32> to vector<1x1x1xf32>
    %58 = vector.extract %57[0, 0, 0] : f32 from vector<1x1x1xf32>
    %c0_15 = arith.constant 0 : index
    %c0_16 = arith.constant 0 : index
    %59 = memref.load %arg3[%c0_15, %c0_16] : memref<1x1xf32, #tpu.memory_space<smem>>
    memref.store %58, %arg3[%c0_15, %c0_16] : memref<1x1xf32, #tpu.memory_space<smem>>
    return
  }
  func.func @transform_0(%arg0: i32) -> (i32, i32) {
    %c0_i32 = arith.constant 0 : i32
    %c0_i32_0 = arith.constant 0 : i32
    return %arg0, %c0_i32 : i32, i32
  }
  func.func @transform_1(%arg0: i32) -> (i32, i32) {
    %c0_i32 = arith.constant 0 : i32
    %c0_i32_0 = arith.constant 0 : i32
    return %arg0, %c0_i32 : i32, i32
  }
  func.func @transform_2(%arg0: i32) -> (i32, i32) {
    %c0_i32 = arith.constant 0 : i32
    %c0_i32_0 = arith.constant 0 : i32
    return %arg0, %c0_i32 : i32, i32
  }
}

</mosaic_0001>

<bundles_post_ra>
// kernel: tpu_custom_call.1
= control target key start
LH: loop header
LB: loop body
LE: loop exit
PB: predicated region body
PF: predicated region fallthrough
CT: control target
= control target key end

     0   :  { %7 = vsyncpa [#allocation3], 0  ;;  %s223_s0 = inlined_call_operand.hbm [shape: f32[8,32], index: 0, kind: input, shape index: {}]   ;;  %s224_s1 = inlined_call_operand.hbm [shape: f32[8,32], index: 1, kind: input, shape index: {}]   ;;  %s225_s2 = inlined_call_operand.hbm [shape: f32[1,1], index: 2, kind: output, shape index: {}]  }
   0x1   :  { %8 = vsyncpa [#allocation6], 0 }
   0x2   :  { %9 = vsyncpa [#allocation4], 0  ;;  %s191_s9 = smov [#allocation2]   ;;  %s192_s11 = smov [#allocation5]  }
   0x3   :  { %s16_s10 = sshll.u32 %s191_s9, 4  ;;  %s26_s12 = sshll.u32 %s192_s11, 4  ;;  %s17_s10 = int_to_ptr.vmem [resolvable:$true] %s16_s10  ;;  %s27_s12 = int_to_ptr.vmem [resolvable:$true] %s26_s12 }
   0x4   :  { %s145_s13 = scalar_lea.vmem %s17_s10, 128  ;;  %p150_p1 = scmp.lt.s32.totalorder %s17_s10, %s17_s10 }
   0x5   :  { %p146_p0 = scmp.ne.s32.totalorder %s17_s10, %s145_s13  ;;  %p151_p2 = scmp.lt.s32.totalorder %s145_s13, %s145_s13 }
   0x7   :  { %p152_p3 = por %p151_p2, %p150_p1 }
   0x9   :  { %p153_p4 = pnand %p152_p3, %p146_p0 }
   0xb   :  { %156 = shalt.err (!%p153_p4)
}
   0xc   :  { %19 = dma.hbm_to_vmem [thread:$0]  %s223_s0, 128, %s17_s10, [#allocation3]  }
   0xd   :  { %s165_s16 = scalar_lea.vmem %s27_s12, 128  ;;  %p170_p6 = scmp.lt.s32.totalorder %s27_s12, %s27_s12 }
   0xe   :  { %p166_p5 = scmp.ne.s32.totalorder %s27_s12, %s165_s16  ;;  %p171_p7 = scmp.lt.s32.totalorder %s165_s16, %s165_s16 }
  0x10   :  { %p172_p8 = por %p171_p7, %p170_p6 }
  0x12   :  { %p173_p9 = pnand %p172_p8, %p166_p5 }
  0x14   :  { %176 = shalt.err (!%p173_p9)
}
  0x15   :  { %29 = dma.hbm_to_vmem [thread:$0]  %s224_s1, 128, %s27_s12, [#allocation6]  }
  0x16   :  { %185 = dma.done.wait [#allocation3], 128  }
  0x17   :  { %186 = vsyncadd [#allocation3], 4294967168 }
  0x18   :  { %187 = dma.done.wait [#allocation6], 128  }
  0x19   :  { %188 = vsyncadd [#allocation6], 4294967168  ;;  %vm38_vm0 = vcmask 261120   ;;  %v36_v0 = vld [vmem:[#allocation2] sm:$0xff]  ;;  %v37_v1 = vld [vmem:[#allocation5] sm:$0xff]  ;;  %vm90_vm1 = vcmask 7168  }
  0x1a   :  { %v39_v2 = vsel %vm38_vm0, %v36_v0, -inf  ;;  %v55_v3 = vsel %vm38_vm0, %v37_v1, -inf  ;;  %s193_s1 = smov [#allocation7]  }
  0x1b   :  { %40 = vmax.xlane.f32.xlu0 %v39_v2 }
  0x1f   :  { %56 = vmax.xlane.f32.xlu0 %v55_v3 }
  0xa4   :  { %v41_v4 = vpop.xlane.xlu0 %40 }
  0xa5   :  { %v42_v5 = vsub.f32 %v36_v0, %v41_v4 }
  0xa7   :  { %v43_v6 = vmul.f32 1.442695, %v42_v5 }
  0xa8   :  { %v57_v7 = vpop.xlane.xlu0 %56 }
  0xa9   :  { %123 = vpow2.f32 %v43_v6  ;;  %v58_v8 = vsub.f32 %v37_v1, %v57_v7 }
  0xab   :  { %v59_v9 = vmul.f32 1.442695, %v58_v8 }
  0xad   :  { %125 = vpow2.f32 %v59_v9 }
  0xb6   :  { %v124_v10 = vpop.eup %123 }
  0xb7   :  { %v45_v11 = vsel %vm38_vm0, %v124_v10, 0.0 }
  0xb8   :  { %46 = vadd.xlane.f32.xlu1 %v45_v11 }
  0xba   :  { %v126_v12 = vpop.eup %125 }
  0xbb   :  { %v61_v13 = vsel %vm38_vm0, %v126_v12, 0.0 }
  0xbc   :  { %62 = vadd.xlane.f32.xlu1 %v61_v13 }
 0x141   :  { %v47_v14 = vpop.xlane.xlu1 %46 }
 0x142   :  { %127 = vrcp.f32 %v47_v14 }
 0x145   :  { %v63_v15 = vpop.xlane.xlu1 %62 }
 0x146   :  { %129 = vrcp.f32 %v63_v15 }
 0x147   :  { %131 = vlog2.f32 %v63_v15 }
 0x148   :  { %133 = vlog2.f32 %v47_v14 }
 0x14f   :  { %v128_v16 = vpop.eup %127 }
 0x150   :  { %v49_v17 = vmul.f32 %v128_v16, %v124_v10 }
 0x152   :  { %v50_v20 = vmax.f32 %v49_v17, 1e-08 }
 0x153   :  { %v130_v18 = vpop.eup %129 }
 0x154   :  { %v65_v19 = vmul.f32 %v130_v18, %v126_v12  ;;  %v132_v23 = vpop.eup %131 }
 0x155   :  { %v134_v25 = vpop.eup %133  ;;  %v68_v26 = vmul.f32 0.6931472, %v132_v23 }
 0x156   :  { %v66_v21 = vmax.f32 %v65_v19, 1e-08  ;;  %v52_v27 = vmul.f32 0.6931472, %v134_v25 }
 0x157   :  { %v69_v28 = vsub.f32 %v58_v8, %v68_v26 }
 0x158   :  { %v71_v22 = vadd.f32 %v66_v21, %v50_v20  ;;  %v53_v29 = vsub.f32 %v42_v5, %v52_v27 }
 0x159   :  { %v70_v30 = vmax.f32 %v69_v28, -18.420681 }
 0x15a   :  { %v72_v24 = vmul.f32 0.5, %v71_v22  ;;  %v54_v31 = vmax.f32 %v53_v29, -18.420681 }
 0x15b   :  { %v76_v32 = vmul.f32 %v70_v30, %v66_v21 }
 0x15c   :  { %135 = vlog2.f32 %v72_v24  ;;  %v75_v35 = vmul.f32 %v54_v31, %v50_v20 }
 0x15e   :  { %v77_v36 = vadd.f32 %v76_v32, %v75_v35 }
 0x169   :  { %v136_v33 = vpop.eup %135 }
 0x16a   :  { %v74_v34 = vmul.f32 0.6931472, %v136_v33 }
 0x16c   :  { %v78_v37 = vmul.f32 %v74_v34, %v71_v22 }
 0x16e   :  { %v79_v38 = vsub.f32 %v77_v36, %v78_v37 }
 0x170   :  { %v80_v39 = vsel %vm38_vm0, %v79_v38, 0.0 }
 0x171   :  { %81 = vadd.xlane.f32.xlu0 %v80_v39 }
 0x1fa   :  { %v82_v40 = vpop.xlane.xlu0 %81 }
 0x1fb   :  { %v91_v41 = vsel %vm90_vm1, %v82_v40, 0.0 }
 0x1fc   :  { %92 = vadd.xlane.f32.xlu1 %v91_v41 }
 0x285   :  { %v93_v42 = vpop.xlane.xlu1 %92 }
 0x286   :  { %v94_v43 = vrot.slane %v93_v42, 4 }
 0x288   :  { %v95_v44 = vadd.f32 %v94_v43, %v93_v42 }
 0x28a   :  { %v96_v45 = vrot.slane %v95_v44, 2 }
 0x28c   :  { %v97_v46 = vadd.f32 %v96_v45, %v95_v44 }
 0x28e   :  { %v98_v47 = vrot.slane %v97_v46, 1 }
 0x290   :  { %v99_v48 = vadd.f32 %v98_v47, %v97_v46 }
 0x292   :  { %118 = vpush %v99_v48 }
 0x2c3   :  { %s119_s0 = spop %118 }
 0x2c4   :  { %102 = sst [smem:[#allocation7]] %s119_s0 }
 0x2c5   :  { %110 = dma.smem_to_hbm %s193_s1, 16, %s225_s2, [#allocation4]  }
 0x2c6   :  { %189 = dma.done.wait [#allocation4], 16  }
 0x2c7   :  { %190 = vsyncadd [#allocation4], 4294967280 }
 0x2c8   :  { %114 = sfence }
 0x2c9   :  { %115 = vsyncpa [#allocation3], 1 }
 0x2ca   :  { %116 = vsyncpa [#allocation6], 1 }
 0x2cb   :  { %117 = vsyncpa [#allocation4], 1 }

</bundles_post_ra>
